<compile_context>
chip_gen: v7x
topology: tpu7x:2x2x1
jax: 0.10.0
libtpu: 0.0.40
codegen_flags: <defaults>
</compile_context>

<pallas_src>
import jax
import jax.numpy as jnp
from jax.experimental import pallas as pl
from jax.experimental.pallas import tpu as pltpu


def mlp_kernel(x_ref, w1_ref, b1_ref, w2_ref, b2_ref, w3_ref, b3_ref, o_ref):
    # Layer 1: (TB,15) @ (15,64) + (1,64) -> ReLU
    h1 = jnp.dot(x_ref[...], w1_ref[...], preferred_element_type=jnp.float32)
    h1 = jnp.maximum(h1 + b1_ref[...], 0.0)
    # Layer 2: (TB,64) @ (64,32) + (1,32) -> ReLU
    h2 = jnp.dot(h1, w2_ref[...], preferred_element_type=jnp.float32)
    h2 = jnp.maximum(h2 + b2_ref[...], 0.0)
    # Layer 3: (TB,32) @ (32,2) + (1,2), no activation
    h3 = jnp.dot(h2, w3_ref[...], preferred_element_type=jnp.float32)
    o_ref[...] = (h3 + b3_ref[...]).astype(o_ref.dtype)


def feedforward_nn(x, params, *, tile_b=512):
    """Forward pass. x: (B, 15) f32. Returns (B, 2)."""
    w1, b1, w2, b2, w3, b3 = params
    B, in_dim = x.shape
    h1_dim, h2_dim, out_dim = w1.shape[1], w2.shape[1], w3.shape[1]

    # Tile the batch axis: multiple of 8 sublanes, clamped to the (padded) batch.
    b_pad8 = ((B + 7) // 8) * 8
    tile_b = max(8, min(((tile_b + 7) // 8) * 8, b_pad8))
    grid_b = pl.cdiv(b_pad8, tile_b)
    b_pad = grid_b * tile_b
    if b_pad != B:
        x = jnp.pad(x, ((0, b_pad - B), (0, 0)))

    # Weights/biases: constant block index -> stay VMEM-resident across grid steps.
    resident = lambda arr: pl.BlockSpec(arr.shape, lambda i: (0, 0))

    itemsize = jnp.dtype(x.dtype).itemsize
    flops = 2 * b_pad * (in_dim * h1_dim + h1_dim * h2_dim + h2_dim * out_dim)
    bytes_accessed = (
        b_pad * in_dim * itemsize
        + sum(int(a.size) * jnp.dtype(a.dtype).itemsize for a in params)
        + b_pad * out_dim * itemsize
    )

    out = pl.pallas_call(
        mlp_kernel,
        out_shape=jax.ShapeDtypeStruct((b_pad, out_dim), x.dtype),
        grid=(grid_b,),
        in_specs=[
            pl.BlockSpec((tile_b, in_dim), lambda i: (i, 0)),   # x: tiled over batch
            resident(w1), resident(b1),
            resident(w2), resident(b2),
            resident(w3), resident(b3),
        ],
        out_specs=pl.BlockSpec((tile_b, out_dim), lambda i: (i, 0)),
        compiler_params=pltpu.CompilerParams(
            dimension_semantics=("parallel",),
        ),
        cost_estimate=pl.CostEstimate(
            flops=flops, transcendentals=0, bytes_accessed=bytes_accessed),
    )(x, w1, b1, w2, b2, w3, b3)

    return out[:B] if b_pad != B else out


def init_params(key):
    """Deterministic init mimicking PyTorch nn.Linear default
    (U[-1/sqrt(fan_in), +1/sqrt(fan_in)]).

    Weights stored as (in_features, out_features); biases as (1, out_features).
    """
    dims = [(15, 64), (64, 32), (32, 2)]
    params = []
    for (fan_in, fan_out) in dims:
        key, kw, kb = jax.random.split(key, 3)
        bound = 1.0 / jnp.sqrt(fan_in)
        w = jax.random.uniform(kw, (fan_in, fan_out), jnp.float32, -bound, bound)
        b = jax.random.uniform(kb, (1, fan_out), jnp.float32, -bound, bound)
        params.extend([w, b])
    return tuple(params)


def reference(x, params):
    w1, b1, w2, b2, w3, b3 = params
    h1 = jnp.maximum(x @ w1 + b1, 0.0)
    h2 = jnp.maximum(h1 @ w2 + b2, 0.0)
    return h2 @ w3 + b3


if __name__ == "__main__":
    key = jax.random.PRNGKey(0)
    key, kx1, kx2 = jax.random.split(key, 3)
    params = init_params(key)

    # Small batch; input features = 3 * 5 = 15 as implied by fc1.
    x = jax.random.normal(kx1, (8, 15), jnp.float32)
    out = jax.block_until_ready(feedforward_nn(x, params))
    ref = reference(x, params)
    assert out.shape == (8, 2), out.shape
    assert jnp.allclose(out, ref, atol=1e-5, rtol=1e-5), "mismatch vs reference (B=8)"

    # Second check: batch not divisible by tile -> exercises grid + padding path.
    x2 = jax.random.normal(kx2, (40, 15), jnp.float32)
    out2 = jax.block_until_ready(feedforward_nn(x2, params, tile_b=16))
    ref2 = reference(x2, params)
    assert out2.shape == (40, 2), out2.shape
    assert jnp.allclose(out2, ref2, atol=1e-5, rtol=1e-5), "mismatch vs reference (B=40)"

    print("KERNEL_OK")
</pallas_src>

<mosaic_0001>
module attributes {stable_mosaic.version = 11 : i64} {
  func.func @mlp_kernel(%arg0: i32, %arg1: memref<8x15xf32, #tpu.memory_space<vmem>>, %arg2: memref<15x64xf32, #tpu.memory_space<vmem>>, %arg3: memref<1x64xf32, #tpu.memory_space<vmem>>, %arg4: memref<64x32xf32, #tpu.memory_space<vmem>>, %arg5: memref<1x32xf32, #tpu.memory_space<vmem>>, %arg6: memref<32x2xf32, #tpu.memory_space<vmem>>, %arg7: memref<1x2xf32, #tpu.memory_space<vmem>>, %arg8: memref<8x2xf32, #tpu.memory_space<vmem>>) attributes {dimension_semantics = [#tpu.dimension_semantics<parallel>], iteration_bounds = array<i64: 1>, scalar_prefetch = 0 : i64, scratch_operands = 0 : i64, tpu.core_type = #tpu.core_type<tc>, window_params = [{transform_indices = @transform_0, window_bounds = array<i64: 8, 15>}, {pipeline_mode = #tpu.pipeline_mode<synchronous>, transform_indices = @transform_1, window_bounds = array<i64: 15, 64>}, {pipeline_mode = #tpu.pipeline_mode<synchronous>, transform_indices = @transform_2, window_bounds = array<i64: 1, 64>}, {pipeline_mode = #tpu.pipeline_mode<synchronous>, transform_indices = @transform_3, window_bounds = array<i64: 64, 32>}, {pipeline_mode = #tpu.pipeline_mode<synchronous>, transform_indices = @transform_4, window_bounds = array<i64: 1, 32>}, {pipeline_mode = #tpu.pipeline_mode<synchronous>, transform_indices = @transform_5, window_bounds = array<i64: 32, 2>}, {pipeline_mode = #tpu.pipeline_mode<synchronous>, transform_indices = @transform_6, window_bounds = array<i64: 1, 2>}, {transform_indices = @transform_7, window_bounds = array<i64: 8, 2>}]} {
    %c0 = arith.constant 0 : index
    %c0_0 = arith.constant 0 : index
    %0 = vector.load %arg1[%c0, %c0_0] : memref<8x15xf32, #tpu.memory_space<vmem>>, vector<8x15xf32>
    %c0_1 = arith.constant 0 : index
    %c0_2 = arith.constant 0 : index
    %1 = vector.load %arg2[%c0_1, %c0_2] : memref<15x64xf32, #tpu.memory_space<vmem>>, vector<15x64xf32>
    %cst = arith.constant dense<0.000000e+00> : vector<8x64xf32>
    %2 = tpu.matmul %0, %1, %cst {dimension_numbers = #tpu.dot_dimension_numbers<[1], [0], [0], [1], [0, 0, 1, 1], [], []>} : vector<8x15xf32>, vector<15x64xf32>, vector<8x64xf32> -> vector<8x64xf32>
    %c0_3 = arith.constant 0 : index
    %c0_4 = arith.constant 0 : index
    %3 = vector.load %arg3[%c0_3, %c0_4] : memref<1x64xf32, #tpu.memory_space<vmem>>, vector<1x64xf32>
    %4 = vector.broadcast %3 : vector<1x64xf32> to vector<8x64xf32>
    %5 = arith.addf %2, %4 : vector<8x64xf32>
    %cst_5 = arith.constant 0.000000e+00 : f32
    %6 = vector.broadcast %cst_5 : f32 to vector<8x64xf32>
    %7 = arith.maximumf %5, %6 : vector<8x64xf32>
    %c0_6 = arith.constant 0 : index
    %c0_7 = arith.constant 0 : index
    %8 = vector.load %arg4[%c0_6, %c0_7] : memref<64x32xf32, #tpu.memory_space<vmem>>, vector<64x32xf32>
    %cst_8 = arith.constant dense<0.000000e+00> : vector<8x32xf32>
    %9 = tpu.matmul %7, %8, %cst_8 {dimension_numbers = #tpu.dot_dimension_numbers<[1], [0], [0], [1], [0, 0, 1, 1], [], []>} : vector<8x64xf32>, vector<64x32xf32>, vector<8x32xf32> -> vector<8x32xf32>
    %c0_9 = arith.constant 0 : index
    %c0_10 = arith.constant 0 : index
    %10 = vector.load %arg5[%c0_9, %c0_10] : memref<1x32xf32, #tpu.memory_space<vmem>>, vector<1x32xf32>
    %11 = vector.broadcast %10 : vector<1x32xf32> to vector<8x32xf32>
    %12 = arith.addf %9, %11 : vector<8x32xf32>
    %cst_11 = arith.constant 0.000000e+00 : f32
    %13 = vector.broadcast %cst_11 : f32 to vector<8x32xf32>
    %14 = arith.maximumf %12, %13 : vector<8x32xf32>
    %c0_12 = arith.constant 0 : index
    %c0_13 = arith.constant 0 : index
    %15 = vector.load %arg6[%c0_12, %c0_13] : memref<32x2xf32, #tpu.memory_space<vmem>>, vector<32x2xf32>
    %cst_14 = arith.constant dense<0.000000e+00> : vector<8x2xf32>
    %16 = tpu.matmul %14, %15, %cst_14 {dimension_numbers = #tpu.dot_dimension_numbers<[1], [0], [0], [1], [0, 0, 1, 1], [], []>} : vector<8x32xf32>, vector<32x2xf32>, vector<8x2xf32> -> vector<8x2xf32>
    %c0_15 = arith.constant 0 : index
    %c0_16 = arith.constant 0 : index
    %17 = vector.load %arg7[%c0_15, %c0_16] : memref<1x2xf32, #tpu.memory_space<vmem>>, vector<1x2xf32>
    %18 = vector.broadcast %17 : vector<1x2xf32> to vector<8x2xf32>
    %19 = arith.addf %16, %18 : vector<8x2xf32>
    %c0_17 = arith.constant 0 : index
    %c0_18 = arith.constant 0 : index
    %20 = vector.load %arg8[%c0_17, %c0_18] : memref<8x2xf32, #tpu.memory_space<vmem>>, vector<8x2xf32>
    tpu.vector_store %arg8[%c0_17, %c0_18], %19 {strides = array<i32>} : memref<8x2xf32, #tpu.memory_space<vmem>>, vector<8x2xf32>,
    return
  }
  func.func @transform_0(%arg0: i32) -> (i32, i32) {
    %c0_i32 = arith.constant 0 : i32
    %c0_i32_0 = arith.constant 0 : i32
    return %arg0, %c0_i32 : i32, i32
  }
  func.func @transform_1(%arg0: i32) -> (i32, i32) {
    %c0_i32 = arith.constant 0 : i32
    %c0_i32_0 = arith.constant 0 : i32
    %c0_i32_1 = arith.constant 0 : i32
    return %c0_i32, %c0_i32_0 : i32, i32
  }
  func.func @transform_2(%arg0: i32) -> (i32, i32) {
    %c0_i32 = arith.constant 0 : i32
    %c0_i32_0 = arith.constant 0 : i32
    %c0_i32_1 = arith.constant 0 : i32
    return %c0_i32, %c0_i32_0 : i32, i32
  }
  func.func @transform_3(%arg0: i32) -> (i32, i32) {
    %c0_i32 = arith.constant 0 : i32
    %c0_i32_0 = arith.constant 0 : i32
    %c0_i32_1 = arith.constant 0 : i32
    return %c0_i32, %c0_i32_0 : i32, i32
  }
  func.func @transform_4(%arg0: i32) -> (i32, i32) {
    %c0_i32 = arith.constant 0 : i32
    %c0_i32_0 = arith.constant 0 : i32
    %c0_i32_1 = arith.constant 0 : i32
    return %c0_i32, %c0_i32_0 : i32, i32
  }
  func.func @transform_5(%arg0: i32) -> (i32, i32) {
    %c0_i32 = arith.constant 0 : i32
    %c0_i32_0 = arith.constant 0 : i32
    %c0_i32_1 = arith.constant 0 : i32
    return %c0_i32, %c0_i32_0 : i32, i32
  }
  func.func @transform_6(%arg0: i32) -> (i32, i32) {
    %c0_i32 = arith.constant 0 : i32
    %c0_i32_0 = arith.constant 0 : i32
    %c0_i32_1 = arith.constant 0 : i32
    return %c0_i32, %c0_i32_0 : i32, i32
  }
  func.func @transform_7(%arg0: i32) -> (i32, i32) {
    %c0_i32 = arith.constant 0 : i32
    %c0_i32_0 = arith.constant 0 : i32
    return %arg0, %c0_i32 : i32, i32
  }
}

</mosaic_0001>

<bundles_post_ra>
// kernel: tpu_custom_call.1
= control target key start
LH: loop header
LB: loop body
LE: loop exit
PB: predicated region body
PF: predicated region fallthrough
CT: control target
= control target key end

     0   :  { %vm40_vm0 = vcmask 1046528   ;;  %v383_v0 = vmov 0.0|0.0   ;;  %vm384_vm1 = vmmov 1   ;;  %vm385_vm3 = vmmov 0   ;;  %s487_s1 = inlined_call_operand.vmem [shape: f32[15,64], index: 1, kind: input, shape index: {}]   ;;  %s488_s3 = inlined_call_operand.vmem [shape: f32[64,32], index: 3, kind: input, shape index: {}]   ;;  %s489_s0 = inlined_call_operand.vmem [shape: f32[8,15], index: 0, kind: input, shape index: {}]   ;;  %s490_s5 = inlined_call_operand.vmem [shape: f32[32,2], index: 5, kind: input, shape index: {}]   ;;  %s491_s2 = inlined_call_operand.vmem [shape: f32[1,64], index: 2, kind: input, shape index: {}]   ;;  %s492_s4 = inlined_call_operand.vmem [shape: f32[1,32], index: 4, kind: input, shape index: {}]   ;;  %s493_s6 = inlined_call_operand.vmem [shape: f32[1,2], index: 6, kind: input, shape index: {}]   ;;  %s494_s7 = inlined_call_operand.vmem [shape: f32[8,2], index: 7, kind: output, shape index: {}]  }
   0x1   :  { %357 = vmatprep.subr.bf16.mxu0 %v383_v0  ;;  %v27_v1 = vld [vmem:[%s487_s1] sm:$0xff]  ;;  %v28_v2 = vld [vmem:[%s487_s1 + $0x8] sm:$0x7f]  ;;  %vm359_vm2 = vmpackc.low %vm40_vm0, %vm384_vm1  ;;  %361 = vmatprep.subr.bf16.mxu1 %v383_v0  ;;  %v386_v4 = vmov 0.0   ;;  %vm36_vm4 = vcmask 121856   ;;  %vm130_vm5 = vcmask 523264  }
   0x2   :  { %v358_v3 = vpack.c.bf16 %v28_v2, %v27_v1  ;;  %324 = vmatprep.mubr.msk.f32.mxu0 %vm385_vm3, %v386_v4  ;;  %v115_v5 = vld [vmem:[%s488_s3] sm:$0xff]  ;;  %v116_v6 = vld [vmem:[%s488_s3 + $0x8] sm:$0xff]  ;;  %343 = vmatprep.mubr.msk.f32.mxu1 %vm385_vm3, %v386_v4  ;;  %v117_v8 = vld [vmem:[%s488_s3 + $0x10] sm:$0xff]  ;;  %vm216_vm6 = vcmask 261120   ;;  %vm290_vm7 = vcmask 15360  }
   0x3   :  { %v362_v7 = vpack.c.bf16 %v116_v6, %v115_v5  ;;  %v118_v9 = vld [vmem:[%s488_s3 + $0x18] sm:$0xff]  ;;  %v26_v10 = vld [vmem:[%s489_s0] sm:$0xff]  ;;  %v120_v13 = vld [vmem:[%s488_s3 + $0x28] sm:$0xff] }
   0x4   :  { %360 = vmatpush3.bf16.msk.msra.mxu0 %vm359_vm2, %v358_v3  ;;  %v365_v11 = vpack.c.bf16 %v118_v9, %v117_v8  ;;  %v119_v12 = vld [vmem:[%s488_s3 + $0x20] sm:$0xff]  ;;  %v121_v15 = vld [vmem:[%s488_s3 + $0x30] sm:$0xff]  ;;  %v122_v16 = vld [vmem:[%s488_s3 + $0x38] sm:$0xff] }
   0x5   :  { %363 = vmatpush3.bf16.msra.mxu1 %v362_v7  ;;  %373 = vmatprep.subr.bf16.mxu0 %v383_v0  ;;  %v368_v14 = vpack.c.bf16 %v120_v13, %v119_v12  ;;  %v371_v17 = vpack.c.bf16 %v122_v16, %v121_v15  ;;  %v205_v18 = vld [vmem:[%s490_s5] sm:$0xff]  ;;  %v206_v19 = vld [vmem:[%s490_s5 + $0x8] sm:$0xff]  ;;  %v207_v26 = vld [vmem:[%s490_s5 + $0x10] sm:$0xff] }
   0x6   :  { %364 = vmatprep.subr.bf16.mxu1 %v383_v0  ;;  %v374_v20 = vpack.c.bf16 %v206_v19, %v205_v18  ;;  %v296_v21 = vld [vmem:[%s491_s2] ss:$0 sm:$0xff]  ;;  %v208_v27 = vld [vmem:[%s490_s5 + $0x18] sm:$0xff] }
   0x7   :  { %325 = vmatmul.mubr.msk.f32.vlgmr.msra.gmra.mrb[0].mxu0 %vm36_vm4, %v26_v10  ;;  %v377_v28 = vpack.c.bf16 %v208_v27, %v207_v26  ;;  %v299_v29 = vld [vmem:[%s492_s4] ss:$0 sm:$0xff] }
   0x8   :  { %354 = vmatprep.mubr.msk.f32.mxu0 %vm385_vm3, %v386_v4  ;;  %375 = vmatpush3.bf16.msra.mxu0 %v374_v20  ;;  %v301_v34 = vld [vmem:[%s493_s6] ss:$0 sm:$0xff] }
   0x9   :  { %366 = vmatpush3.bf16.msra.mxu1 %v365_v11  ;;  %376 = vmatprep.subr.bf16.mxu0 %v383_v0 }
   0xa   :  { %367 = vmatprep.subr.bf16.mxu1 %v383_v0 }
   0xc   :  { %378 = vmatpush3.bf16.msra.mxu0 %v377_v28 }
   0xd   :  { %369 = vmatpush3.bf16.msra.mxu1 %v368_v14 }
   0xe   :  { %370 = vmatprep.subr.bf16.mxu1 %v383_v0 }
  0x11   :  { %372 = vmatpush3.bf16.msra.mxu1 %v371_v17 }
  0xda   :  { %v110_v22 = vpop.f32.mrb[0].mxu0 }
  0xdb   :  { %v111_v23 = vadd.f32 %v296_v21, %v110_v22  ;;  %v326_v24 = vpop.f32.mrb[1].mxu0 }
  0xdd   :  { %v114_v25 = vmax.f32 %v111_v23, 0.0 }
  0xdf   :  { %344 = vmatmul.mubr.msk.f32.vlgmr.msra.gmra.mrb[0].mxu1 %vm130_vm5, %v114_v25 }
 0x1b2   :  { %v200_v30 = vpop.f32.mrb[0].mxu1 }
 0x1b3   :  { %v201_v31 = vadd.f32 %v299_v29, %v200_v30  ;;  %v345_v32 = vpop.f32.mrb[1].mxu1 }
 0x1b5   :  { %v204_v33 = vmax.f32 %v201_v31, 0.0 }
 0x1b7   :  { %355 = vmatmul.mubr.msk.f32.vlgmr.msra.gmra.mrb[2].mxu0 %vm216_vm6, %v204_v33 }
 0x28a   :  { %v286_v35 = vpop.f32.mrb[2].mxu0 }
 0x28b   :  { %v287_v36 = vadd.f32 %v301_v34, %v286_v35  ;;  %v356_v37 = vpop.f32.mrb[3].mxu0 }
 0x28d   :  { %291 = vst.msk [vmem:[%s494_s7] sm:$0xff] %vm290_vm7, %v287_v36 }

</bundles_post_ra>
